<compile_context>
chip_gen: v7x
topology: tpu7x:2x2x1
jax: 0.10.0
libtpu: 0.0.40
codegen_flags: <defaults>
</compile_context>

<pallas_src>
import functools

import jax
import jax.numpy as jnp
from jax.experimental import pallas as pl
from jax.experimental.pallas import tpu as pltpu

KH = KW = 4
STRIDE = 2
PAD = 1
LEAKY_SLOPE = 0.2
IN_EPS = 1e-5  # nn.InstanceNorm2d default eps


def _round_up(x, m):
    return (x + m - 1) // m * m


def _disc_block_kernel(x_ref, w_ref, b_ref, m_ref, o_ref, *,
                       owp, inv_count, normalization):
    """One batch element.

    x_ref: (1, 4, Cin, Lin) bf16  parity planes, spatially flattened + padded
    w_ref: (16, Cout, Cin)  bf16  spectrally-normalized conv taps
    b_ref: (Cout, 1)        f32   conv bias
    m_ref: (1, L)           f32   validity mask over the output-slab lanes
    o_ref: (1, Cout, L)           channel-major output slab
    """
    cout = w_ref.shape[1]
    L = o_ref.shape[2]

    acc = jnp.zeros((cout, L), jnp.float32)
    # 16 tap matmuls: tap (kh, kw) of the 4x4 stride-2 conv reads parity plane
    # (kh % 2, kw % 2) shifted by (kh // 2, kw // 2) in the downsampled grid.
    for pr in range(2):
        for pc in range(2):
            plane = x_ref[0, 2 * pr + pc]                    # (Cin, Lin) bf16
            for qh in range(2):
                for qc in range(2):
                    kh, kw = 2 * qh + pr, 2 * qc + pc
                    start = qh * owp + qc                    # static shift
                    acc = acc + jnp.dot(
                        w_ref[kh * KW + kw],                 # (Cout, Cin)
                        plane[:, start:start + L],           # (Cin, L)
                        preferred_element_type=jnp.float32)

    y = acc + b_ref[...]                                     # bias, (Cout,1) bcast
    if normalization:
        # InstanceNorm2d (affine=False): per-channel stats over the VALID
        # spatial positions only (the slab has one garbage column per row plus
        # tail padding -> masked one-pass sum / sumsq in f32).
        m = m_ref[...]                                       # (1, L)
        ym = y * m
        mean = jnp.sum(ym, axis=1, keepdims=True) * inv_count
        ex2 = jnp.sum(ym * ym, axis=1, keepdims=True) * inv_count
        var = jnp.maximum(ex2 - mean * mean, 0.0)
        y = (y - mean) * jax.lax.rsqrt(var + IN_EPS)
    y = jnp.where(y > 0, y, LEAKY_SLOPE * y)                 # LeakyReLU(0.2)
    o_ref[0] = y.astype(o_ref.dtype)


def spectral_normalize(weight, u0, n_power_iterations=10, eps=1e-12):
    """Mimics torch.nn.utils.spectral_norm: W / sigma_max(W.reshape(Cout, -1)),
    sigma estimated by power iteration (deterministic u0). Plain JAX glue."""
    cout = weight.shape[0]
    w_mat = weight.reshape(cout, -1)

    def _l2n(v):
        return v / (jnp.linalg.norm(v) + eps)

    def body(_, u):
        v = _l2n(w_mat.T @ u)
        return _l2n(w_mat @ v)

    u = jax.lax.fori_loop(0, n_power_iterations, body, _l2n(u0))
    v = _l2n(w_mat.T @ u)
    sigma = u @ (w_mat @ v)
    return weight / sigma


def discriminator_block(x_nchw, weight, bias, *, normalization=True):
    """Forward of Discriminator_block.
    x_nchw: (N, Cin, H, W); weight: OIHW (already spectrally normalized); bias: (Cout,)."""
    N, Cin, H, W = x_nchw.shape
    Cout = weight.shape[0]
    OH = (H + 2 * PAD - KH) // STRIDE + 1
    OW = (W + 2 * PAD - KW) // STRIDE + 1
    OHp, OWp = OH + 1, OW + 1
    L = _round_up(OH * OWp, 128)           # lane-dense output slab length
    Lin = _round_up(OWp + 1 + L, 128)      # input plane length (covers max tap shift)

    # ---- XLA glue: pad + space-to-depth parity split (~1x input bytes; no im2col) ----
    xp = jnp.pad(x_nchw, ((0, 0), (0, 0), (PAD, PAD), (PAD, PAD)))
    xp = xp[:, :, :2 * OHp, :2 * OWp]
    planes = xp.reshape(N, Cin, OHp, 2, OWp, 2)              # [n, c, i, pr, j, pc]
    planes = planes.transpose(0, 3, 5, 1, 2, 4)              # (N, pr, pc, Cin, OHp, OWp)
    planes = planes.reshape(N, 4, Cin, OHp * OWp)
    planes = jnp.pad(planes, ((0, 0), (0, 0), (0, 0), (0, Lin - OHp * OWp)))
    planes = planes.astype(jnp.bfloat16)

    # Weight as 16 taps of shape (Cout, Cin), tap index t = kh*KW + kw.
    w16 = jnp.transpose(weight, (2, 3, 0, 1)).reshape(KH * KW, Cout, Cin)
    w16 = w16.astype(jnp.bfloat16)
    b2 = bias.astype(jnp.float32).reshape(Cout, 1)

    # Valid-lane mask for the (Cout, L) slab: position f = oh*OWp + ow is valid
    # iff f < OH*OWp and (f mod OWp) < OW.
    f = jnp.arange(L, dtype=jnp.int32)
    mask = ((f < OH * OWp) & (f % OWp < OW)).astype(jnp.float32).reshape(1, L)

    kernel = functools.partial(_disc_block_kernel, owp=OWp,
                               inv_count=1.0 / float(OH * OW),
                               normalization=normalization)
    out = pl.pallas_call(
        kernel,
        out_shape=jax.ShapeDtypeStruct((N, Cout, L), x_nchw.dtype),
        grid_spec=pltpu.PrefetchScalarGridSpec(
            num_scalar_prefetch=0,
            grid=(N,),
            in_specs=[
                pl.BlockSpec((1, 4, Cin, Lin), lambda n: (n, 0, 0, 0)),
                pl.BlockSpec((KH * KW, Cout, Cin), lambda n: (0, 0, 0)),
                pl.BlockSpec((Cout, 1), lambda n: (0, 0)),
                pl.BlockSpec((1, L), lambda n: (0, 0)),
            ],
            out_specs=pl.BlockSpec((1, Cout, L), lambda n: (n, 0, 0)),
        ),
        compiler_params=pltpu.CompilerParams(
            dimension_semantics=("parallel",),
            vmem_limit_bytes=64 * 1024 * 1024),
    )(planes, w16, b2, mask)

    # Drop one garbage column per row + tail padding; result is already NCHW.
    y = out[:, :, :OH * OWp].reshape(N, Cout, OH, OWp)
    return y[:, :, :, :OW]


def _reference(x_nchw, weight, bias, *, normalization=True):
    """Pure-JAX f32 reference of the same forward pass (sanity check)."""
    y = jax.lax.conv_general_dilated(
        x_nchw, weight, window_strides=(STRIDE, STRIDE),
        padding=((PAD, PAD), (PAD, PAD)),
        dimension_numbers=("NCHW", "OIHW", "NCHW"),
        precision=jax.lax.Precision.HIGHEST)
    y = y + bias[None, :, None, None]
    if normalization:
        mean = jnp.mean(y, axis=(2, 3), keepdims=True)
        var = jnp.mean((y - mean) ** 2, axis=(2, 3), keepdims=True)
        y = (y - mean) * jax.lax.rsqrt(var + IN_EPS)
    return jnp.where(y > 0, y, LEAKY_SLOPE * y)


if __name__ == "__main__":
    key = jax.random.PRNGKey(0)
    k_x, k_w, k_b, k_u = jax.random.split(key, 4)

    # Small shapes consistent with the module: in_filters=4, out_filters=8.
    N, Cin, H, W = 2, 4, 16, 16
    Cout = 8

    x = jax.random.normal(k_x, (N, Cin, H, W), dtype=jnp.float32)

    # Deterministic Conv2d parameters (PyTorch OIHW layout, uniform fan-in init),
    # then spectral normalization (power iteration) applied to the weight.
    fan_in = Cin * KH * KW
    bound = 1.0 / jnp.sqrt(jnp.float32(fan_in))
    w_raw = jax.random.uniform(k_w, (Cout, Cin, KH, KW), jnp.float32, -bound, bound)
    bias = jax.random.uniform(k_b, (Cout,), jnp.float32, -bound, bound)
    u0 = jax.random.normal(k_u, (Cout,), dtype=jnp.float32)
    w_sn = spectral_normalize(w_raw, u0)

    out = discriminator_block(x, w_sn, bias, normalization=True)
    out = jax.block_until_ready(out)

    ref = _reference(x, w_sn, bias, normalization=True)
    assert out.shape == (N, Cout, H // 2, W // 2), out.shape
    assert bool(jnp.all(jnp.isfinite(out)))
    max_err = float(jnp.max(jnp.abs(out - ref)))
    assert max_err < 3e-2, f"max abs err {max_err}"

    print("KERNEL_OK")
</pallas_src>

<mosaic_0001>
module attributes {stable_mosaic.version = 11 : i64} {
  func.func @_disc_block_kernel(%arg0: i32, %arg1: memref<1x4x4x256xbf16, #tpu.memory_space<vmem>>, %arg2: memref<16x8x4xbf16, #tpu.memory_space<vmem>>, %arg3: memref<8x1xf32, #tpu.memory_space<vmem>>, %arg4: memref<1x128xf32, #tpu.memory_space<vmem>>, %arg5: memref<1x8x128xf32, #tpu.memory_space<vmem>>) attributes {dimension_semantics = [#tpu.dimension_semantics<parallel>], iteration_bounds = array<i64: 2>, scalar_prefetch = 0 : i64, scratch_operands = 0 : i64, tpu.core_type = #tpu.core_type<tc>, window_params = [{transform_indices = @transform_0, window_bounds = array<i64: 1, 4, 4, 256>}, {pipeline_mode = #tpu.pipeline_mode<synchronous>, transform_indices = @transform_1, window_bounds = array<i64: 16, 8, 4>}, {pipeline_mode = #tpu.pipeline_mode<synchronous>, transform_indices = @transform_2, window_bounds = array<i64: 8, 1>}, {pipeline_mode = #tpu.pipeline_mode<synchronous>, transform_indices = @transform_3, window_bounds = array<i64: 1, 128>}, {transform_indices = @transform_4, window_bounds = array<i64: 1, 8, 128>}]} {
    %cst = arith.constant 0.000000e+00 : f32
    %0 = vector.broadcast %cst : f32 to vector<8x128xf32>
    %c0 = arith.constant 0 : index
    %c0_0 = arith.constant 0 : index
    %c0_1 = arith.constant 0 : index
    %c0_2 = arith.constant 0 : index
    %1 = vector.load %arg1[%c0, %c0_0, %c0_1, %c0_2] : memref<1x4x4x256xbf16, #tpu.memory_space<vmem>>, vector<1x1x4x256xbf16>
    %2 = vector.shape_cast %1 : vector<1x1x4x256xbf16> to vector<4x256xbf16>
    %c0_3 = arith.constant 0 : index
    %c0_4 = arith.constant 0 : index
    %c0_5 = arith.constant 0 : index
    %3 = vector.load %arg2[%c0_3, %c0_4, %c0_5] : memref<16x8x4xbf16, #tpu.memory_space<vmem>>, vector<1x8x4xbf16>
    %4 = vector.shape_cast %3 : vector<1x8x4xbf16> to vector<8x4xbf16>
    %5 = vector.extract_strided_slice %2 {offsets = [0, 0], sizes = [4, 128], strides = [1, 1]} : vector<4x256xbf16> to vector<4x128xbf16>
    %cst_6 = arith.constant dense<0.000000e+00> : vector<8x128xf32>
    %6 = tpu.matmul %4, %5, %cst_6 {dimension_numbers = #tpu.dot_dimension_numbers<[1], [0], [0], [1], [0, 0, 1, 1], [], []>} : vector<8x4xbf16>, vector<4x128xbf16>, vector<8x128xf32> -> vector<8x128xf32>
    %7 = arith.addf %0, %6 : vector<8x128xf32>
    %c2 = arith.constant 2 : index
    %c0_7 = arith.constant 0 : index
    %c0_8 = arith.constant 0 : index
    %8 = vector.load %arg2[%c2, %c0_7, %c0_8] : memref<16x8x4xbf16, #tpu.memory_space<vmem>>, vector<1x8x4xbf16>
    %9 = vector.shape_cast %8 : vector<1x8x4xbf16> to vector<8x4xbf16>
    %10 = vector.extract_strided_slice %2 {offsets = [0, 1], sizes = [4, 128], strides = [1, 1]} : vector<4x256xbf16> to vector<4x128xbf16>
    %cst_9 = arith.constant dense<0.000000e+00> : vector<8x128xf32>
    %11 = tpu.matmul %9, %10, %cst_9 {dimension_numbers = #tpu.dot_dimension_numbers<[1], [0], [0], [1], [0, 0, 1, 1], [], []>} : vector<8x4xbf16>, vector<4x128xbf16>, vector<8x128xf32> -> vector<8x128xf32>
    %12 = arith.addf %7, %11 : vector<8x128xf32>
    %c8 = arith.constant 8 : index
    %c0_10 = arith.constant 0 : index
    %c0_11 = arith.constant 0 : index
    %13 = vector.load %arg2[%c8, %c0_10, %c0_11] : memref<16x8x4xbf16, #tpu.memory_space<vmem>>, vector<1x8x4xbf16>
    %14 = vector.shape_cast %13 : vector<1x8x4xbf16> to vector<8x4xbf16>
    %15 = vector.extract_strided_slice %2 {offsets = [0, 9], sizes = [4, 128], strides = [1, 1]} : vector<4x256xbf16> to vector<4x128xbf16>
    %cst_12 = arith.constant dense<0.000000e+00> : vector<8x128xf32>
    %16 = tpu.matmul %14, %15, %cst_12 {dimension_numbers = #tpu.dot_dimension_numbers<[1], [0], [0], [1], [0, 0, 1, 1], [], []>} : vector<8x4xbf16>, vector<4x128xbf16>, vector<8x128xf32> -> vector<8x128xf32>
    %17 = arith.addf %12, %16 : vector<8x128xf32>
    %c10 = arith.constant 10 : index
    %c0_13 = arith.constant 0 : index
    %c0_14 = arith.constant 0 : index
    %18 = vector.load %arg2[%c10, %c0_13, %c0_14] : memref<16x8x4xbf16, #tpu.memory_space<vmem>>, vector<1x8x4xbf16>
    %19 = vector.shape_cast %18 : vector<1x8x4xbf16> to vector<8x4xbf16>
    %20 = vector.extract_strided_slice %2 {offsets = [0, 10], sizes = [4, 128], strides = [1, 1]} : vector<4x256xbf16> to vector<4x128xbf16>
    %cst_15 = arith.constant dense<0.000000e+00> : vector<8x128xf32>
    %21 = tpu.matmul %19, %20, %cst_15 {dimension_numbers = #tpu.dot_dimension_numbers<[1], [0], [0], [1], [0, 0, 1, 1], [], []>} : vector<8x4xbf16>, vector<4x128xbf16>, vector<8x128xf32> -> vector<8x128xf32>
    %22 = arith.addf %17, %21 : vector<8x128xf32>
    %c0_16 = arith.constant 0 : index
    %c1 = arith.constant 1 : index
    %c0_17 = arith.constant 0 : index
    %c0_18 = arith.constant 0 : index
    %23 = vector.load %arg1[%c0_16, %c1, %c0_17, %c0_18] : memref<1x4x4x256xbf16, #tpu.memory_space<vmem>>, vector<1x1x4x256xbf16>
    %24 = vector.shape_cast %23 : vector<1x1x4x256xbf16> to vector<4x256xbf16>
    %c1_19 = arith.constant 1 : index
    %c0_20 = arith.constant 0 : index
    %c0_21 = arith.constant 0 : index
    %25 = vector.load %arg2[%c1_19, %c0_20, %c0_21] : memref<16x8x4xbf16, #tpu.memory_space<vmem>>, vector<1x8x4xbf16>
    %26 = vector.shape_cast %25 : vector<1x8x4xbf16> to vector<8x4xbf16>
    %27 = vector.extract_strided_slice %24 {offsets = [0, 0], sizes = [4, 128], strides = [1, 1]} : vector<4x256xbf16> to vector<4x128xbf16>
    %cst_22 = arith.constant dense<0.000000e+00> : vector<8x128xf32>
    %28 = tpu.matmul %26, %27, %cst_22 {dimension_numbers = #tpu.dot_dimension_numbers<[1], [0], [0], [1], [0, 0, 1, 1], [], []>} : vector<8x4xbf16>, vector<4x128xbf16>, vector<8x128xf32> -> vector<8x128xf32>
    %29 = arith.addf %22, %28 : vector<8x128xf32>
    %c3 = arith.constant 3 : index
    %c0_23 = arith.constant 0 : index
    %c0_24 = arith.constant 0 : index
    %30 = vector.load %arg2[%c3, %c0_23, %c0_24] : memref<16x8x4xbf16, #tpu.memory_space<vmem>>, vector<1x8x4xbf16>
    %31 = vector.shape_cast %30 : vector<1x8x4xbf16> to vector<8x4xbf16>
    %32 = vector.extract_strided_slice %24 {offsets = [0, 1], sizes = [4, 128], strides = [1, 1]} : vector<4x256xbf16> to vector<4x128xbf16>
    %cst_25 = arith.constant dense<0.000000e+00> : vector<8x128xf32>
    %33 = tpu.matmul %31, %32, %cst_25 {dimension_numbers = #tpu.dot_dimension_numbers<[1], [0], [0], [1], [0, 0, 1, 1], [], []>} : vector<8x4xbf16>, vector<4x128xbf16>, vector<8x128xf32> -> vector<8x128xf32>
    %34 = arith.addf %29, %33 : vector<8x128xf32>
    %c9 = arith.constant 9 : index
    %c0_26 = arith.constant 0 : index
    %c0_27 = arith.constant 0 : index
    %35 = vector.load %arg2[%c9, %c0_26, %c0_27] : memref<16x8x4xbf16, #tpu.memory_space<vmem>>, vector<1x8x4xbf16>
    %36 = vector.shape_cast %35 : vector<1x8x4xbf16> to vector<8x4xbf16>
    %37 = vector.extract_strided_slice %24 {offsets = [0, 9], sizes = [4, 128], strides = [1, 1]} : vector<4x256xbf16> to vector<4x128xbf16>
    %cst_28 = arith.constant dense<0.000000e+00> : vector<8x128xf32>
    %38 = tpu.matmul %36, %37, %cst_28 {dimension_numbers = #tpu.dot_dimension_numbers<[1], [0], [0], [1], [0, 0, 1, 1], [], []>} : vector<8x4xbf16>, vector<4x128xbf16>, vector<8x128xf32> -> vector<8x128xf32>
    %39 = arith.addf %34, %38 : vector<8x128xf32>
    %c11 = arith.constant 11 : index
    %c0_29 = arith.constant 0 : index
    %c0_30 = arith.constant 0 : index
    %40 = vector.load %arg2[%c11, %c0_29, %c0_30] : memref<16x8x4xbf16, #tpu.memory_space<vmem>>, vector<1x8x4xbf16>
    %41 = vector.shape_cast %40 : vector<1x8x4xbf16> to vector<8x4xbf16>
    %42 = vector.extract_strided_slice %24 {offsets = [0, 10], sizes = [4, 128], strides = [1, 1]} : vector<4x256xbf16> to vector<4x128xbf16>
    %cst_31 = arith.constant dense<0.000000e+00> : vector<8x128xf32>
    %43 = tpu.matmul %41, %42, %cst_31 {dimension_numbers = #tpu.dot_dimension_numbers<[1], [0], [0], [1], [0, 0, 1, 1], [], []>} : vector<8x4xbf16>, vector<4x128xbf16>, vector<8x128xf32> -> vector<8x128xf32>
    %44 = arith.addf %39, %43 : vector<8x128xf32>
    %c0_32 = arith.constant 0 : index
    %c2_33 = arith.constant 2 : index
    %c0_34 = arith.constant 0 : index
    %c0_35 = arith.constant 0 : index
    %45 = vector.load %arg1[%c0_32, %c2_33, %c0_34, %c0_35] : memref<1x4x4x256xbf16, #tpu.memory_space<vmem>>, vector<1x1x4x256xbf16>
    %46 = vector.shape_cast %45 : vector<1x1x4x256xbf16> to vector<4x256xbf16>
    %c4 = arith.constant 4 : index
    %c0_36 = arith.constant 0 : index
    %c0_37 = arith.constant 0 : index
    %47 = vector.load %arg2[%c4, %c0_36, %c0_37] : memref<16x8x4xbf16, #tpu.memory_space<vmem>>, vector<1x8x4xbf16>
    %48 = vector.shape_cast %47 : vector<1x8x4xbf16> to vector<8x4xbf16>
    %49 = vector.extract_strided_slice %46 {offsets = [0, 0], sizes = [4, 128], strides = [1, 1]} : vector<4x256xbf16> to vector<4x128xbf16>
    %cst_38 = arith.constant dense<0.000000e+00> : vector<8x128xf32>
    %50 = tpu.matmul %48, %49, %cst_38 {dimension_numbers = #tpu.dot_dimension_numbers<[1], [0], [0], [1], [0, 0, 1, 1], [], []>} : vector<8x4xbf16>, vector<4x128xbf16>, vector<8x128xf32> -> vector<8x128xf32>
    %51 = arith.addf %44, %50 : vector<8x128xf32>
    %c6 = arith.constant 6 : index
    %c0_39 = arith.constant 0 : index
    %c0_40 = arith.constant 0 : index
    %52 = vector.load %arg2[%c6, %c0_39, %c0_40] : memref<16x8x4xbf16, #tpu.memory_space<vmem>>, vector<1x8x4xbf16>
    %53 = vector.shape_cast %52 : vector<1x8x4xbf16> to vector<8x4xbf16>
    %54 = vector.extract_strided_slice %46 {offsets = [0, 1], sizes = [4, 128], strides = [1, 1]} : vector<4x256xbf16> to vector<4x128xbf16>
    %cst_41 = arith.constant dense<0.000000e+00> : vector<8x128xf32>
    %55 = tpu.matmul %53, %54, %cst_41 {dimension_numbers = #tpu.dot_dimension_numbers<[1], [0], [0], [1], [0, 0, 1, 1], [], []>} : vector<8x4xbf16>, vector<4x128xbf16>, vector<8x128xf32> -> vector<8x128xf32>
    %56 = arith.addf %51, %55 : vector<8x128xf32>
    %c12 = arith.constant 12 : index
    %c0_42 = arith.constant 0 : index
    %c0_43 = arith.constant 0 : index
    %57 = vector.load %arg2[%c12, %c0_42, %c0_43] : memref<16x8x4xbf16, #tpu.memory_space<vmem>>, vector<1x8x4xbf16>
    %58 = vector.shape_cast %57 : vector<1x8x4xbf16> to vector<8x4xbf16>
    %59 = vector.extract_strided_slice %46 {offsets = [0, 9], sizes = [4, 128], strides = [1, 1]} : vector<4x256xbf16> to vector<4x128xbf16>
    %cst_44 = arith.constant dense<0.000000e+00> : vector<8x128xf32>
    %60 = tpu.matmul %58, %59, %cst_44 {dimension_numbers = #tpu.dot_dimension_numbers<[1], [0], [0], [1], [0, 0, 1, 1], [], []>} : vector<8x4xbf16>, vector<4x128xbf16>, vector<8x128xf32> -> vector<8x128xf32>
    %61 = arith.addf %56, %60 : vector<8x128xf32>
    %c14 = arith.constant 14 : index
    %c0_45 = arith.constant 0 : index
    %c0_46 = arith.constant 0 : index
    %62 = vector.load %arg2[%c14, %c0_45, %c0_46] : memref<16x8x4xbf16, #tpu.memory_space<vmem>>, vector<1x8x4xbf16>
    %63 = vector.shape_cast %62 : vector<1x8x4xbf16> to vector<8x4xbf16>
    %64 = vector.extract_strided_slice %46 {offsets = [0, 10], sizes = [4, 128], strides = [1, 1]} : vector<4x256xbf16> to vector<4x128xbf16>
    %cst_47 = arith.constant dense<0.000000e+00> : vector<8x128xf32>
    %65 = tpu.matmul %63, %64, %cst_47 {dimension_numbers = #tpu.dot_dimension_numbers<[1], [0], [0], [1], [0, 0, 1, 1], [], []>} : vector<8x4xbf16>, vector<4x128xbf16>, vector<8x128xf32> -> vector<8x128xf32>
    %66 = arith.addf %61, %65 : vector<8x128xf32>
    %c0_48 = arith.constant 0 : index
    %c3_49 = arith.constant 3 : index
    %c0_50 = arith.constant 0 : index
    %c0_51 = arith.constant 0 : index
    %67 = vector.load %arg1[%c0_48, %c3_49, %c0_50, %c0_51] : memref<1x4x4x256xbf16, #tpu.memory_space<vmem>>, vector<1x1x4x256xbf16>
    %68 = vector.shape_cast %67 : vector<1x1x4x256xbf16> to vector<4x256xbf16>
    %c5 = arith.constant 5 : index
    %c0_52 = arith.constant 0 : index
    %c0_53 = arith.constant 0 : index
    %69 = vector.load %arg2[%c5, %c0_52, %c0_53] : memref<16x8x4xbf16, #tpu.memory_space<vmem>>, vector<1x8x4xbf16>
    %70 = vector.shape_cast %69 : vector<1x8x4xbf16> to vector<8x4xbf16>
    %71 = vector.extract_strided_slice %68 {offsets = [0, 0], sizes = [4, 128], strides = [1, 1]} : vector<4x256xbf16> to vector<4x128xbf16>
    %cst_54 = arith.constant dense<0.000000e+00> : vector<8x128xf32>
    %72 = tpu.matmul %70, %71, %cst_54 {dimension_numbers = #tpu.dot_dimension_numbers<[1], [0], [0], [1], [0, 0, 1, 1], [], []>} : vector<8x4xbf16>, vector<4x128xbf16>, vector<8x128xf32> -> vector<8x128xf32>
    %73 = arith.addf %66, %72 : vector<8x128xf32>
    %c7 = arith.constant 7 : index
    %c0_55 = arith.constant 0 : index
    %c0_56 = arith.constant 0 : index
    %74 = vector.load %arg2[%c7, %c0_55, %c0_56] : memref<16x8x4xbf16, #tpu.memory_space<vmem>>, vector<1x8x4xbf16>
    %75 = vector.shape_cast %74 : vector<1x8x4xbf16> to vector<8x4xbf16>
    %76 = vector.extract_strided_slice %68 {offsets = [0, 1], sizes = [4, 128], strides = [1, 1]} : vector<4x256xbf16> to vector<4x128xbf16>
    %cst_57 = arith.constant dense<0.000000e+00> : vector<8x128xf32>
    %77 = tpu.matmul %75, %76, %cst_57 {dimension_numbers = #tpu.dot_dimension_numbers<[1], [0], [0], [1], [0, 0, 1, 1], [], []>} : vector<8x4xbf16>, vector<4x128xbf16>, vector<8x128xf32> -> vector<8x128xf32>
    %78 = arith.addf %73, %77 : vector<8x128xf32>
    %c13 = arith.constant 13 : index
    %c0_58 = arith.constant 0 : index
    %c0_59 = arith.constant 0 : index
    %79 = vector.load %arg2[%c13, %c0_58, %c0_59] : memref<16x8x4xbf16, #tpu.memory_space<vmem>>, vector<1x8x4xbf16>
    %80 = vector.shape_cast %79 : vector<1x8x4xbf16> to vector<8x4xbf16>
    %81 = vector.extract_strided_slice %68 {offsets = [0, 9], sizes = [4, 128], strides = [1, 1]} : vector<4x256xbf16> to vector<4x128xbf16>
    %cst_60 = arith.constant dense<0.000000e+00> : vector<8x128xf32>
    %82 = tpu.matmul %80, %81, %cst_60 {dimension_numbers = #tpu.dot_dimension_numbers<[1], [0], [0], [1], [0, 0, 1, 1], [], []>} : vector<8x4xbf16>, vector<4x128xbf16>, vector<8x128xf32> -> vector<8x128xf32>
    %83 = arith.addf %78, %82 : vector<8x128xf32>
    %c15 = arith.constant 15 : index
    %c0_61 = arith.constant 0 : index
    %c0_62 = arith.constant 0 : index
    %84 = vector.load %arg2[%c15, %c0_61, %c0_62] : memref<16x8x4xbf16, #tpu.memory_space<vmem>>, vector<1x8x4xbf16>
    %85 = vector.shape_cast %84 : vector<1x8x4xbf16> to vector<8x4xbf16>
    %86 = vector.extract_strided_slice %68 {offsets = [0, 10], sizes = [4, 128], strides = [1, 1]} : vector<4x256xbf16> to vector<4x128xbf16>
    %cst_63 = arith.constant dense<0.000000e+00> : vector<8x128xf32>
    %87 = tpu.matmul %85, %86, %cst_63 {dimension_numbers = #tpu.dot_dimension_numbers<[1], [0], [0], [1], [0, 0, 1, 1], [], []>} : vector<8x4xbf16>, vector<4x128xbf16>, vector<8x128xf32> -> vector<8x128xf32>
    %88 = arith.addf %83, %87 : vector<8x128xf32>
    %c0_64 = arith.constant 0 : index
    %c0_65 = arith.constant 0 : index
    %89 = vector.load %arg3[%c0_64, %c0_65] : memref<8x1xf32, #tpu.memory_space<vmem>>, vector<8x1xf32>
    %90 = vector.broadcast %89 : vector<8x1xf32> to vector<8x128xf32>
    %91 = arith.addf %88, %90 : vector<8x128xf32>
    %c0_66 = arith.constant 0 : index
    %c0_67 = arith.constant 0 : index
    %92 = vector.load %arg4[%c0_66, %c0_67] : memref<1x128xf32, #tpu.memory_space<vmem>>, vector<1x128xf32>
    %93 = vector.broadcast %92 : vector<1x128xf32> to vector<8x128xf32>
    %94 = arith.mulf %91, %93 : vector<8x128xf32>
    %cst_68 = arith.constant dense<0.000000e+00> : vector<8xf32>
    %95 = vector.multi_reduction <add>, %94, %cst_68 [1] : vector<8x128xf32> to vector<8xf32>
    %96 = vector.shape_cast %95 : vector<8xf32> to vector<8x1xf32>
    %cst_69 = arith.constant 1.562500e-02 : f32
    %97 = vector.broadcast %cst_69 : f32 to vector<8x1xf32>
    %98 = arith.mulf %96, %97 : vector<8x1xf32>
    %99 = arith.mulf %94, %94 : vector<8x128xf32>
    %cst_70 = arith.constant dense<0.000000e+00> : vector<8xf32>
    %100 = vector.multi_reduction <add>, %99, %cst_70 [1] : vector<8x128xf32> to vector<8xf32>
    %101 = vector.shape_cast %100 : vector<8xf32> to vector<8x1xf32>
    %cst_71 = arith.constant 1.562500e-02 : f32
    %102 = vector.broadcast %cst_71 : f32 to vector<8x1xf32>
    %103 = arith.mulf %101, %102 : vector<8x1xf32>
    %104 = arith.mulf %98, %98 : vector<8x1xf32>
    %105 = arith.subf %103, %104 : vector<8x1xf32>
    %cst_72 = arith.constant 0.000000e+00 : f32
    %106 = vector.broadcast %cst_72 : f32 to vector<8x1xf32>
    %107 = arith.maximumf %105, %106 : vector<8x1xf32>
    %108 = vector.broadcast %98 : vector<8x1xf32> to vector<8x128xf32>
    %109 = arith.subf %91, %108 : vector<8x128xf32>
    %cst_73 = arith.constant 9.99999974E-6 : f32
    %110 = vector.broadcast %cst_73 : f32 to vector<8x1xf32>
    %111 = arith.addf %107, %110 : vector<8x1xf32>
    %112 = math.rsqrt %111 : vector<8x1xf32>
    %113 = vector.broadcast %112 : vector<8x1xf32> to vector<8x128xf32>
    %114 = arith.mulf %109, %113 : vector<8x128xf32>
    %cst_74 = arith.constant 0.000000e+00 : f32
    %115 = vector.broadcast %cst_74 : f32 to vector<8x128xf32>
    %116 = arith.cmpf ogt, %114, %115 : vector<8x128xf32>
    %cst_75 = arith.constant 2.000000e-01 : f32
    %117 = vector.broadcast %cst_75 : f32 to vector<8x128xf32>
    %118 = arith.mulf %117, %114 : vector<8x128xf32>
    %119 = arith.select %116, %114, %118 : vector<8x128xi1>, vector<8x128xf32>
    %c0_76 = arith.constant 0 : index
    %c0_77 = arith.constant 0 : index
    %c0_78 = arith.constant 0 : index
    %120 = vector.load %arg5[%c0_76, %c0_77, %c0_78] : memref<1x8x128xf32, #tpu.memory_space<vmem>>, vector<1x8x128xf32>
    %121 = vector.shape_cast %120 : vector<1x8x128xf32> to vector<8x128xf32>
    %122 = vector.shape_cast %119 : vector<8x128xf32> to vector<1x8x128xf32>
    tpu.vector_store %arg5[%c0_76, %c0_77, %c0_78], %122 {strides = array<i32>} : memref<1x8x128xf32, #tpu.memory_space<vmem>>, vector<1x8x128xf32>,
    return
  }
  func.func @transform_0(%arg0: i32) -> (i32, i32, i32, i32) {
    %c0_i32 = arith.constant 0 : i32
    %c0_i32_0 = arith.constant 0 : i32
    %c0_i32_1 = arith.constant 0 : i32
    %c0_i32_2 = arith.constant 0 : i32
    return %arg0, %c0_i32, %c0_i32_0, %c0_i32_1 : i32, i32, i32, i32
  }
  func.func @transform_1(%arg0: i32) -> (i32, i32, i32) {
    %c0_i32 = arith.constant 0 : i32
    %c0_i32_0 = arith.constant 0 : i32
    %c0_i32_1 = arith.constant 0 : i32
    %c0_i32_2 = arith.constant 0 : i32
    return %c0_i32, %c0_i32_0, %c0_i32_1 : i32, i32, i32
  }
  func.func @transform_2(%arg0: i32) -> (i32, i32) {
    %c0_i32 = arith.constant 0 : i32
    %c0_i32_0 = arith.constant 0 : i32
    %c0_i32_1 = arith.constant 0 : i32
    return %c0_i32, %c0_i32_0 : i32, i32
  }
  func.func @transform_3(%arg0: i32) -> (i32, i32) {
    %c0_i32 = arith.constant 0 : i32
    %c0_i32_0 = arith.constant 0 : i32
    %c0_i32_1 = arith.constant 0 : i32
    return %c0_i32, %c0_i32_0 : i32, i32
  }
  func.func @transform_4(%arg0: i32) -> (i32, i32, i32) {
    %c0_i32 = arith.constant 0 : i32
    %c0_i32_0 = arith.constant 0 : i32
    %c0_i32_1 = arith.constant 0 : i32
    return %arg0, %c0_i32, %c0_i32_0 : i32, i32, i32
  }
}

</mosaic_0001>

<bundles_post_ra>
// kernel: tpu_custom_call.1
= control target key start
LH: loop header
LB: loop body
LE: loop exit
PB: predicated region body
PF: predicated region fallthrough
CT: control target
= control target key end

     0   :  { %9 = vsyncpa [#allocation3], 0  ;;  %s2168_s0 = inlined_call_operand.hbm [shape: bf16[2,4,4,256], index: 0, kind: input, shape index: {}]   ;;  %s2169_s1 = inlined_call_operand.hbm [shape: bf16[16,8,4], index: 1, kind: input, shape index: {}]   ;;  %s2170_s2 = inlined_call_operand.hbm [shape: f32[8,1], index: 2, kind: input, shape index: {}]   ;;  %s2171_s3 = inlined_call_operand.hbm [shape: f32[1,128], index: 3, kind: input, shape index: {}]   ;;  %s2172_s4 = inlined_call_operand.hbm [shape: f32[2,8,128], index: 4, kind: output, shape index: {}]  }
   0x1   :  { %11 = vsyncpa [#allocation3 + $0x1], 0 }
   0x2   :  { %12 = vsyncpa [#allocation6], 0 }
   0x3   :  { %13 = vsyncpa [#allocation9], 0 }
   0x4   :  { %14 = vsyncpa [#allocation4], 0 }
   0x5   :  { %16 = vsyncpa [#allocation4 + $0x1], 0  ;;  %s1778_s15 = smov 0   ;;  %s1780_s16 = smov 0  }
   0x6   :  { %s1782_s17 = smov 0   ;;  %s1784_s18 = smov 0  }
   0x7 LB: > { %s1799_s19 = sadd.s32 4294967295, %s1737_s18   ;;  %s1292_s20 = sadd.s32 4294967294, %s1737_s18   ;;  %s1737_s18 = sphi %s1784_s18, %s2195_s18   ;;  %s1733_s17 = sphi %s1782_s17, %s2194_s17   ;;  %s1729_s16 = sphi %s1780_s16, %s2193_s16   ;;  %s1725_s15 = sphi %s1778_s15, %s2192_s15  }
   0x8   : > { %p42_p0 = scmp.ne.s32.totalorder %s1729_s16, %s1725_s15  ;;  %p2173_p1 = scmp.eq.s32.totalorder %s1799_s19, 0 }
   0x9   : > { %p135_p3 = scmp.eq.s32.totalorder %s1292_s20, 1  ;;  %p1293_p5 = scmp.ge.s32.totalorder %s1737_s18, 1 }
   0xa   : > { %p1808_p4 = por %p2173_p1, %p42_p0  ;;  %p142_p7 = scmp.lt.s32.totalorder %s1737_s18, 3 }
   0xb   : > { %p1813_p6 = por %p135_p3, %p42_p0  ;;  %s1739_s24 = smov [#allocation5]  }
   0xc   : > { %s2176_s21 = scalar_select %p1808_p4, 1, 0 }
   0xd   : > { %s2177_s22 = scalar_select %p1813_p6, 1, 0 }
   0xe   : > { %p1818_p8 = pnand %p1293_p5, %p142_p7  ;;  %s154_s25 = sshll.u32 %s1739_s24, 4  ;;  %s1822_s25 = int_to_ptr.vmem [resolvable:$true] %s154_s25 }
   0xf   : > { %s1740_s27 = smov [#allocation7]   ;;  %s1741_s29 = smov [#allocation8]  }
  0x10   : > { %s2178_s23 = scalar_select %p1818_p8, 1, 0 }
  0x11   : > { %p1476_p9 = pneg %p1818_p8  ;;  %s168_s28 = sshll.u32 %s1740_s27, 4  ;;  %s1833_s28 = int_to_ptr.vmem [resolvable:$true] %s168_s28 }
  0x12   : > { %s1835_s30 = sshll.u32 %s1741_s29, 4  ;;  %s1549_s7 = scalar_lea.hbm %s2169_s1, 1024  ;;  %s180_s30 = int_to_ptr.vmem [resolvable:$true] %s1835_s30 }
  0x13   : > { %p1829_p11 = pnand %p1476_p9, %p2173_p1  ;;  %p1550_p12 = scmp.ne.s32.totalorder %s2169_s1, %s1549_s7 }
  0x14   : > { %p1556_p5 = scmp.lt.u32.totalorder %s1549_s7, %s2169_s1 }
  0x15   : > { %p1845_p13 = pneg %p1829_p11 }
  0x17   : > { %p1552_p0 = pnand %p1845_p13, %p1550_p12 }
  0x19   : > { %p1553_p3 = pneg %p1552_p0 }
  0x1b   : > { %p1558_p7 = pnand %p1556_p5, %p1553_p3 }
  0x1d   : > { %1561 = shalt.err (!%p1558_p7)
}
  0x1e   : > { %s1562_s13 = scalar_lea.vmem %s1822_s25, 1024  ;;  %p1570_p2 = scmp.lt.s32.totalorder %s1822_s25, %s1822_s25 }
  0x1f   : > { %p1563_p9 = scmp.ne.s32.totalorder %s1822_s25, %s1562_s13  ;;  %p1571_p6 = scmp.lt.s32.totalorder %s1562_s13, %s1562_s13 }
  0x21   : > { %p1565_p10 = pnand %p1563_p9, %p1845_p13  ;;  %p1572_p12 = por %p1571_p6, %p1570_p2 }
  0x23   : > { %p1566_p1 = pneg %p1565_p10 }
  0x25   : > { %p1573_p0 = pnand %p1572_p12, %p1566_p1 }
  0x27   : > { %1576 = shalt.err (!%p1573_p0)
}
  0x28   : > { %s1742_s14 = smov 64   ;;  %s1743_s20 = smov 4  }
  0x29   : > { %1479 = dma.hbm_to_vmem [thread:$0]  (!%p1829_p11), %s2169_s1, 1024, %s1822_s25, [#allocation6], %s1742_s14, %s1742_s14, %s1743_s20  }
  0x2a   : > { %s1577_s6 = scalar_lea.hbm %s2170_s2, 128 }
  0x2b   : > { %p1578_p1 = scmp.ne.s32.totalorder %s2170_s2, %s1577_s6  ;;  %p1584_p10 = scmp.lt.u32.totalorder %s1577_s6, %s2170_s2 }
  0x2d   : > { %p1580_p2 = pnand %p1578_p1, %p1845_p13 }
  0x2f   : > { %p1581_p6 = pneg %p1580_p2 }
  0x31   : > { %p1586_p3 = pnand %p1584_p10, %p1581_p6 }
  0x33   : > { %1589 = shalt.err (!%p1586_p3)
}
  0x34   : > { %s1590_s25 = scalar_lea.vmem %s1833_s28, 128  ;;  %p1598_p12 = scmp.lt.s32.totalorder %s1833_s28, %s1833_s28 }
  0x35   : > { %p1591_p5 = scmp.ne.s32.totalorder %s1833_s28, %s1590_s25  ;;  %p1599_p0 = scmp.lt.s32.totalorder %s1590_s25, %s1590_s25 }
  0x37   : > { %p1593_p7 = pnand %p1591_p5, %p1845_p13  ;;  %p1600_p1 = por %p1599_p0, %p1598_p12 }
  0x39   : > { %p1594_p9 = pneg %p1593_p7 }
  0x3b   : > { %p1601_p2 = pnand %p1600_p1, %p1594_p9 }
  0x3d   : > { %1604 = shalt.err (!%p1601_p2)
}
  0x3e   : > { %1482 = dma.hbm_to_vmem [thread:$0]  (!%p1829_p11), %s2170_s2, 128, %s1833_s28, [#allocation6]  }
  0x3f   : > { %s1605_s29 = scalar_lea.hbm %s2171_s3, 16 }
  0x40   : > { %p1606_p6 = scmp.ne.s32.totalorder %s2171_s3, %s1605_s29  ;;  %p1612_p5 = scmp.lt.u32.totalorder %s1605_s29, %s2171_s3 }
  0x42   : > { %p1608_p10 = pnand %p1606_p6, %p1845_p13 }
  0x44   : > { %p1609_p3 = pneg %p1608_p10 }
  0x46   : > { %p1614_p7 = pnand %p1612_p5, %p1609_p3 }
  0x48   : > { %1617 = shalt.err (!%p1614_p7)
}
  0x49   : > { %s1618_s9 = scalar_lea.vmem %s180_s30, 16  ;;  %s1625_s28 = scalar_lea.vmem %s180_s30, 32 }
  0x4a   : > { %p1619_p9 = scmp.ne.s32.totalorder %s180_s30, %s1618_s9  ;;  %p1626_p1 = scmp.lt.s32.totalorder %s180_s30, %s180_s30 }
  0x4b   : > { %p1627_p2 = scmp.lt.s32.totalorder %s1625_s28, %s1618_s9 }
  0x4c   : > { %p1621_p12 = pnand %p1619_p9, %p1845_p13 }
  0x4d   : > { %p1628_p4 = por %p1627_p2, %p1626_p1 }
  0x4e   : > { %p1622_p0 = pneg %p1621_p12 }
  0x50   : > { %p1629_p8 = pnand %p1628_p4, %p1622_p0 }
  0x52   : > { %1632 = shalt.err (!%p1629_p8)
}
  0x53   : > { %1485 = dma.hbm_to_vmem [thread:$0]  (!%p1829_p11), %s2171_s3, 16, %s180_s30, [#allocation9]  }
  0x54   : > { %s1912_s10 = sadd.s32 1, %s1737_s18   ;;  %s29_s26 = sadd.s32 1, %s1733_s17 }
  0x55   : > { %s26_s12 = ssub.s32 %s1737_s18, %s1912_s10  ;;  %p36_p8 = scmp.ne.s32.totalorder %s1733_s17, %s1729_s16 }
  0x56   : > { %p27_p4 = scmp.eq.s32.totalorder %s26_s12, 0  ;;  %p37_p13 = scmp.eq.s32.totalorder %s1737_s18, 0 }
  0x57   : > { %p1497_p6 = scmp.lt.s32.totalorder %s1737_s18, 2  ;;  %p2181_p3 = scmp.eq.s32.totalorder %s1799_s19, 1 }
  0x58   : > { %s1922_s13 = scalar_select %p27_p4, %s1733_s17, %s29_s26  }
  0x59   : > { %p38_p10 = por %p37_p13, %p36_p8  ;;  %p1926_p5 = por %p2181_p3, %p36_p8 }
  0x5a   : > { %s190_s27 = sand.u32 1, %s1733_s17   ;;  %s1331_s29 = sshll.u32 %s1737_s18, 8 }
  0x5b   : > { %s1298_s30 = sshll.u32 %s190_s27, 4  ;;  %s1935_s7 = scalar_lea.hbm %s2168_s0, %s1331_s29 }
  0x5c   : > { %s194_s8 = scalar_lea.vmem [#allocation2], %s1298_s30  ;;  %p1937_p11 = pnand %p1497_p6, %p38_p10 }
  0x5d   : > { %s201_s9 = sshll.u32 %s194_s8, 4  ;;  %s1943_s11 = scalar_lea.sflag [#allocation3], %s190_s27  ;;  %s1941_s9 = int_to_ptr.vmem [resolvable:$true] %s201_s9 }
  0x5e   : > { %s1633_s25 = scalar_lea.hbm %s1935_s7, 256  ;;  %p1635_p9 = pneg %p1937_p11 }
  0x5f   : > { %p1634_p7 = scmp.ne.s32.totalorder %s1935_s7, %s1633_s25  ;;  %s1638_s29 = scalar_lea.hbm %s2168_s0, 512 }
  0x60   : > { %p1639_p1 = scmp.lt.u32.totalorder %s1935_s7, %s2168_s0  ;;  %p1640_p2 = scmp.lt.u32.totalorder %s1638_s29, %s1633_s25 }
  0x61   : > { %p1636_p12 = pnand %p1635_p9, %p1634_p7  ;;  %p1642_p8 = scmp.lt.u32.totalorder %s1633_s25, %s1935_s7 }
  0x62   : > { %p1641_p4 = por %p1640_p2, %p1639_p1 }
  0x63   : > { %p1637_p0 = pneg %p1636_p12 }
  0x64   : > { %p1643_p13 = por %p1642_p8, %p1641_p4 }
  0x66   : > { %p1644_p6 = pnand %p1643_p13, %p1637_p0 }
  0x68   : > { %1647 = shalt.err (!%p1644_p6)
}
  0x69   : > { %s1648_s27 = scalar_lea.vmem %s1941_s9, 256  ;;  %s1744_s6 = smov [#allocation2]  }
  0x6a   : > { %p1649_p10 = scmp.ne.s32.totalorder %s1941_s9, %s1648_s27  ;;  %s1653_s8 = sshll.u32 %s1744_s6, 4  ;;  %s1654_s8 = int_to_ptr.vmem [resolvable:$false] %s1653_s8 }
  0x6b   : > { %s1655_s12 = scalar_lea.vmem %s1654_s8, 512  ;;  %p1656_p12 = scmp.lt.s32.totalorder %s1941_s9, %s1654_s8 }
  0x6c   : > { %p1651_p3 = pnand %p1649_p10, %p1635_p9  ;;  %p1657_p1 = scmp.lt.s32.totalorder %s1655_s12, %s1648_s27 }
  0x6e   : > { %p1652_p7 = pneg %p1651_p3  ;;  %p1658_p2 = por %p1657_p1, %p1656_p12 }
  0x70   : > { %p1659_p4 = pnand %p1658_p2, %p1652_p7 }
  0x72   : > { %1662 = shalt.err (!%p1659_p4)
}
  0x73   : > { %1489 = dma.hbm_to_vmem [thread:$0]  (!%p1937_p11), %s1935_s7, 256, %s1941_s9, %s1943_s11, %s1742_s14, %s1742_s14, %s1743_s20  }
  0x74   : > { %p2184_p9 = scmp.ne.s32.totalorder %s2178_s23, 0 }
  0x75   : > { %s1977_s25 = sand.u32 (!%p2184_p9), 1, %s1729_s16   ;;  %p2185_p0 = scmp.ne.s32.totalorder (!%p2184_p9), %s2176_s21, 0 }
  0x76   : > { %213 = sbr.rel (%p2184_p9) target bundleno = 724 (0x2d4), region = 36  ;;  %s1302_s26 = sshll.u32 (!%p2184_p9), %s1977_s25, 4 }
  0x77   : > { %s216_s29 = scalar_lea.sflag (!%p2184_p9), [#allocation3], %s1977_s25  ;;  %s1981_s30 = scalar_lea.vmem (!%p2184_p9), [#allocation2], %s1302_s26 }
  0x7d   : > { %1708 = dma.done.wait (%p2185_p0), %s216_s29, 256  }
  0x7e   : > { %1710 = vsyncadd (%p2185_p0), %s216_s29, 4294967040  ;;  %p2186_p11 = scmp.eq.s32.totalorder %s1799_s19, 0 }
  0x80   : > { %1712 = dma.done.wait (%p2186_p11), [#allocation6], 1152   ;;  %p2187_p8 = pmov %p2186_p11 }
  0x82   : > { %1714 = vsyncadd (%p2187_p8), [#allocation6], 4294966144  ;;  %p2188_p13 = pmov %p2187_p8 }
  0x83   : > { %p2189_p6 = pmov %p2187_p8 }
  0x84   : > { %1716 = dma.done.wait (%p2188_p13), [#allocation9], 16  }
  0x85   : > { %1718 = vsyncadd (%p2189_p6), [#allocation9], 4294967280  ;;  %v265_v0 = vlaneseq  ;;  %v1745_v1 = vmov 1983009808   ;;  %v1746_v4 = vmov 0.0   ;;  %vm1747_vm0 = vmmov 0  }
  0x86   : > { %v263_v2 = vunpack.c.l.s4 %v1745_v1  ;;  %1364 = vmatprep.subr.bf16.mxu0 %v1746_v4  ;;  %1370 = vmatprep.subr.bf16.mxu1 %v1746_v4  ;;  %vm280_vm1 = vcmask 1041408   ;;  %v257_v7 = vld [vmem:[%s1981_s30] sm:$0xf]  ;;  %vm276_vm2 = vcmask 31744   ;;  %s1748_s21 = smov 119   ;;  %s1749_s23 = smov 127  }
  0x87   : > { %v266_v3 = vshrl.u32 %v265_v0, 7  ;;  %1366 = vmatprep.mubr.msk.bf16.mxu0 %vm1747_vm0, %v1746_v4  ;;  %1372 = vmatprep.mubr.msk.bf16.mxu1 %vm1747_vm0, %v1746_v4  ;;  %v328_v9 = vsel %vm280_vm1, %v257_v7, 0  ;;  %v258_v10 = vld [vmem:[#allocation5] sm:$0xf]  ;;  %v2006_v12 = vld [vmem:[%s1981_s30 + $0x4] sm:$0xf] }
  0x88   : > { %v264_v5 = vunpack.c.0.s8 %v263_v2  ;;  %1371 = vmatpush3.bf16.msra.mxu1 %v328_v9  ;;  %s1750_s14 = smov 118   ;;  %v2018_v15 = vld [vmem:[%s1981_s30 + $0x8] sm:$0xf]  ;;  %v2026_v18 = vld [vmem:[%s1981_s30 + $0xc] sm:$0xf]  ;;  %v1146_v21 = vld [vmem:[#allocation7] sm:$0xff] }
  0x89   : > { %1382 = vmatprep.subr.bf16.mxu1 %v1746_v4  ;;  %v1751_v22 = vmov 0   ;;  %vm274_vm3 = vcmask 1039360   ;;  %vm376_vm4 = vcmask 973824   ;;  %vm431_vm5 = vcmask 965632   ;;  %v260_v30 = vld [vmem:[#allocation5 + $0x8] sm:$0xf] }
  0x8a   : > { %v267_v6 = vsub.s32 %v264_v5, %v266_v3  ;;  %1546 = vset.pattern.permute.xlu0 %v1751_v22  ;;  %v426_v36 = vld [vmem:[#allocation5 + $0x28] sm:$0xf]  ;;  %v371_v41 = vld [vmem:[#allocation5 + $0x20] sm:$0xf]  ;;  %v488_v42 = vsel %vm280_vm1, %v2006_v12, 0  ;;  %v710_v61 = vsel %vm280_vm1, %v2018_v15, 0 }
  0x8b   : > { %1373 = vmatmul.mubr.msk.bf16.vlgmr.msra.gmra.mrb[0].mxu1 %vm276_vm2, %v258_v10  ;;  %v532_v45 = vld [vmem:[#allocation5 + $0xc] sm:$0xf]  ;;  %v483_v51 = vld [vmem:[#allocation5 + $0x4] sm:$0xf]  ;;  %v754_v1 = vld [vmem:[#allocation5 + $0x18] sm:$0xf] }
  0x8c   : > { %v268_v8 = vrot.slane %v257_v7, %v267_v6  ;;  %1384 = vmatprep.mubr.msk.bf16.mxu1 %vm1747_vm0, %v1746_v4  ;;  %v540_v13 = vrot.slane %v2006_v12, %v267_v6  ;;  %v762_v16 = vrot.slane %v2018_v15, %v267_v6  ;;  %v984_v19 = vrot.slane %v2026_v18, %v267_v6  ;;  %v649_v56 = vld [vmem:[#allocation5 + $0x2c] sm:$0xf]  ;;  %v595_v60 = vld [vmem:[#allocation5 + $0x24] sm:$0xf]  ;;  %v705_v7 = vld [vmem:[#allocation5 + $0x10] sm:$0xf] }
  0x8d   : > { %v871_v12 = vld [vmem:[#allocation5 + $0x38] sm:$0xf]  ;;  %s1306_s20 = sshll.u32 %s1977_s25, 3  ;;  %s1328_s7 = sshll.u32 %s1799_s19, 7 }
  0x8e   : > { %372 = vrot.lane.b32.xlu1 %v268_v8, %s1748_s21  ;;  %270 = vrot.lane.b32.xlu0 %v268_v8, %s1749_s23  ;;  %v269_v11 = vcombine.high %v268_v8, %v268_v8  ;;  %v541_v14 = vcombine.high %v540_v13, %v540_v13  ;;  %v763_v17 = vcombine.high %v762_v16, %v762_v16  ;;  %s255_s9 = scalar_lea.vmem [#allocation10], %s1306_s20  ;;  %s2124_s27 = scalar_lea.hbm %s2172_s4, %s1328_s7 }
  0x8f   : > { %v985_v20 = vcombine.high %v984_v19, %v984_v19  ;;  %s1193_s28 = sshll.u32 %s255_s9, 4  ;;  %s1180_s6 = scalar_lea.sflag [#allocation4], %s1977_s25  ;;  %s2126_s28 = int_to_ptr.vmem [resolvable:$true] %s1193_s28 }
  0x90   : > { %s1663_s8 = scalar_lea.vmem %s2126_s28, 128  ;;  %s1752_s19 = smov [#allocation10]  }
  0x91   : > { %p1664_p10 = scmp.ne.s32.totalorder %s2126_s28, %s1663_s8  ;;  %s1667_s12 = sshll.u32 %s1752_s19, 4  ;;  %s1668_s12 = int_to_ptr.vmem [resolvable:$false] %s1667_s12 }
  0x92   : > { %374 = vrot.lane.b32.xlu1 %v269_v11, %s1748_s21  ;;  %272 = vrot.lane.b32.xlu0 %v269_v11, %s1749_s23  ;;  %s1669_s26 = scalar_lea.vmem %s1668_s12, 256  ;;  %p1670_p12 = scmp.lt.s32.totalorder %s2126_s28, %s1668_s12 }
  0x93   : > { %p1665_p3 = pnand %p1664_p10, %p1926_p5  ;;  %p1671_p1 = scmp.lt.s32.totalorder %s1669_s26, %s1663_s8 }
  0x95   : > { %p1666_p7 = pneg %p1665_p3  ;;  %p1672_p2 = por %p1671_p1, %p1670_p12 }
  0x96   : > { %429 = vrot.lane.b32.xlu1 %v269_v11, %s1750_s14  ;;  %427 = vrot.lane.b32.xlu0 %v268_v8, %s1750_s14 }
  0x97   : > { %p1673_p4 = pnand %p1672_p2, %p1666_p7 }
  0x9a   : > { %544 = vrot.lane.b32.xlu1 %v541_v14, %s1749_s23  ;;  %542 = vrot.lane.b32.xlu0 %v540_v13, %s1749_s23 }
  0x9e   : > { %598 = vrot.lane.b32.xlu1 %v541_v14, %s1748_s21  ;;  %596 = vrot.lane.b32.xlu0 %v540_v13, %s1748_s21 }
  0xa2   : > { %652 = vrot.lane.b32.xlu1 %v541_v14, %s1750_s14  ;;  %650 = vrot.lane.b32.xlu0 %v540_v13, %s1750_s14 }
  0xa6   : > { %766 = vrot.lane.b32.xlu1 %v763_v17, %s1749_s23  ;;  %764 = vrot.lane.b32.xlu0 %v762_v16, %s1749_s23 }
  0xaa   : > { %820 = vrot.lane.b32.xlu1 %v763_v17, %s1748_s21  ;;  %818 = vrot.lane.b32.xlu0 %v762_v16, %s1748_s21 }
  0xae   : > { %874 = vrot.lane.b32.xlu1 %v763_v17, %s1750_s14  ;;  %872 = vrot.lane.b32.xlu0 %v762_v16, %s1750_s14  ;;  %v817_v16 = vld [vmem:[#allocation5 + $0x30] sm:$0xf]  ;;  %v932_v17 = vsel %vm280_vm1, %v2026_v18, 0  ;;  %v927_v18 = vld [vmem:[#allocation5 + $0x14] sm:$0xf] }
  0xb2   : > { %988 = vrot.lane.b32.xlu1 %v985_v20, %s1749_s23  ;;  %986 = vrot.lane.b32.xlu0 %v984_v19, %s1749_s23 }
  0xb6   : > { %1042 = vrot.lane.b32.xlu1 %v985_v20, %s1748_s21  ;;  %1040 = vrot.lane.b32.xlu0 %v984_v19, %s1748_s21 }
  0xba   : > { %1096 = vrot.lane.b32.xlu1 %v985_v20, %s1750_s14  ;;  %1094 = vrot.lane.b32.xlu0 %v984_v19, %s1750_s14  ;;  %v976_v20 = vld [vmem:[#allocation5 + $0x1c] sm:$0xf] }
  0xbe   : > { %1149 = vperm.xlu0 %1546, %v1146_v21  }
 0x100   : > { %v373_v23 = vpop.permute.xlu1 %372  ;;  %v271_v24 = vpop.permute.xlu0 %270 }
 0x104   : > { %v375_v25 = vpop.permute.xlu1 %374  ;;  %v273_v26 = vpop.permute.xlu0 %272 }
 0x105   : > { %v275_v27 = vsel %vm274_vm3, %v271_v24, %v273_v26  ;;  %v377_v29 = vsel %vm376_vm4, %v373_v23, %v375_v25  ;;  %v1093_v24 = vld [vmem:[#allocation5 + $0x3c] sm:$0xf]  ;;  %v1039_v25 = vld [vmem:[#allocation5 + $0x34] sm:$0xf] }
 0x106   : > { %v282_v28 = vsel %vm280_vm1, %v275_v27, 0  ;;  %v382_v34 = vsel %vm280_vm1, %v377_v29, 0 }
 0x107   : > { %1365 = vmatpush3.bf16.msra.mxu0 %v282_v28 }
 0x108   : > { %v430_v31 = vpop.permute.xlu1 %429  ;;  %1376 = vmatprep.subr.bf16.mxu0 %v1746_v4  ;;  %v428_v32 = vpop.permute.xlu0 %427 }
 0x109   : > { %v432_v33 = vsel %vm431_vm5, %v428_v32, %v430_v31 }
 0x10a   : > { %1367 = vmatmul.mubr.msk.bf16.vlgmr.msra.gmra.mrb[0].mxu0 %vm276_vm2, %v260_v30  ;;  %v437_v35 = vsel %vm280_vm1, %v432_v33, 0 }
 0x10b   : > { %1377 = vmatpush3.bf16.msra.mxu0 %v382_v34  ;;  %1383 = vmatpush3.bf16.msra.mxu1 %v437_v35 }
 0x10c   : > { %1378 = vmatprep.mubr.msk.bf16.mxu0 %vm1747_vm0, %v1746_v4  ;;  %v545_v37 = vpop.permute.xlu1 %544  ;;  %1388 = vmatprep.subr.bf16.mxu0 %v1746_v4  ;;  %v543_v38 = vpop.permute.xlu0 %542 }
 0x10d   : > { %v546_v39 = vsel %vm274_vm3, %v543_v38, %v545_v37  ;;  %1394 = vmatprep.subr.bf16.mxu1 %v1746_v4 }
 0x10e   : > { %1385 = vmatmul.mubr.msk.bf16.vlgmr.msra.gmra.mrb[4].mxu1 %vm276_vm2, %v426_v36  ;;  %v551_v40 = vsel %vm280_vm1, %v546_v39, 0 }
 0x10f   : > { %1395 = vmatpush3.bf16.msra.mxu1 %v551_v40  ;;  %1396 = vmatprep.mubr.msk.bf16.mxu1 %vm1747_vm0, %v1746_v4 }
 0x110   : > { %v599_v43 = vpop.permute.xlu1 %598  ;;  %v597_v44 = vpop.permute.xlu0 %596  ;;  %1406 = vmatprep.subr.bf16.mxu1 %v1746_v4 }
 0x111   : > { %v600_v48 = vsel %vm376_vm4, %v597_v44, %v599_v43 }
 0x112   : > { %1379 = vmatmul.mubr.msk.bf16.vlgmr.msra.gmra.mrb[4].mxu0 %vm276_vm2, %v371_v41  ;;  %v605_v52 = vsel %vm280_vm1, %v600_v48, 0 }
 0x113   : > { %1389 = vmatpush3.bf16.msra.mxu0 %v488_v42  ;;  %1390 = vmatprep.mubr.msk.bf16.mxu0 %vm1747_vm0, %v1746_v4 }
 0x114   : > { %1400 = vmatprep.subr.bf16.mxu0 %v1746_v4  ;;  %v653_v46 = vpop.permute.xlu1 %652  ;;  %v651_v47 = vpop.permute.xlu0 %650 }
 0x115   : > { %v654_v49 = vsel %vm431_vm5, %v651_v47, %v653_v46 }
 0x116   : > { %1397 = vmatmul.mubr.msk.bf16.vlgmr.msra.gmra.mrb[8].mxu1 %vm276_vm2, %v532_v45  ;;  %v659_v50 = vsel %vm280_vm1, %v654_v49, 0 }
 0x117   : > { %1407 = vmatpush3.bf16.msra.mxu1 %v659_v50  ;;  %1408 = vmatprep.mubr.msk.bf16.mxu1 %vm1747_vm0, %v1746_v4 }
 0x118   : > { %v767_v53 = vpop.permute.xlu1 %766  ;;  %v765_v54 = vpop.permute.xlu0 %764  ;;  %1418 = vmatprep.subr.bf16.mxu1 %v1746_v4 }
 0x119   : > { %v768_v55 = vsel %vm274_vm3, %v765_v54, %v767_v53 }
 0x11a   : > { %1391 = vmatmul.mubr.msk.bf16.vlgmr.msra.gmra.mrb[8].mxu0 %vm276_vm2, %v483_v51  ;;  %v773_v57 = vsel %vm280_vm1, %v768_v55, 0 }
 0x11b   : > { %1401 = vmatpush3.bf16.msra.mxu0 %v605_v52  ;;  %1402 = vmatprep.mubr.msk.bf16.mxu0 %vm1747_vm0, %v1746_v4 }
 0x11c   : > { %1412 = vmatprep.subr.bf16.mxu0 %v1746_v4  ;;  %v821_v58 = vpop.permute.xlu1 %820  ;;  %v819_v59 = vpop.permute.xlu0 %818 }
 0x11d   : > { %v822_v6 = vsel %vm376_vm4, %v819_v59, %v821_v58 }
 0x11e   : > { %1409 = vmatmul.mubr.msk.bf16.vlgmr.msra.gmra.mrb[12].mxu1 %vm276_vm2, %v649_v56  ;;  %v827_v8 = vsel %vm280_vm1, %v822_v6, 0 }
 0x11f   : > { %1419 = vmatpush3.bf16.msra.mxu1 %v773_v57  ;;  %1420 = vmatprep.mubr.msk.bf16.mxu1 %vm1747_vm0, %v1746_v4 }
 0x120   : > { %v875_v62 = vpop.permute.xlu1 %874  ;;  %v873_v63 = vpop.permute.xlu0 %872  ;;  %1430 = vmatprep.subr.bf16.mxu1 %v1746_v4 }
 0x121   : > { %v876_v0 = vsel %vm431_vm5, %v873_v63, %v875_v62 }
 0x122   : > { %1403 = vmatmul.mubr.msk.bf16.vlgmr.msra.gmra.mrb[12].mxu0 %vm276_vm2, %v595_v60  ;;  %v881_v2 = vsel %vm280_vm1, %v876_v0, 0 }
 0x123   : > { %1413 = vmatpush3.bf16.msra.mxu0 %v710_v61  ;;  %1414 = vmatprep.mubr.msk.bf16.mxu0 %vm1747_vm0, %v1746_v4 }
 0x124   : > { %1424 = vmatprep.subr.bf16.mxu0 %v1746_v4  ;;  %v989_v3 = vpop.permute.xlu1 %988  ;;  %v987_v5 = vpop.permute.xlu0 %986 }
 0x125   : > { %v990_v11 = vsel %vm274_vm3, %v987_v5, %v989_v3 }
 0x126   : > { %1421 = vmatmul.mubr.msk.bf16.vlgmr.msra.gmra.mrb[16].mxu1 %vm276_vm2, %v754_v1  ;;  %v995_v13 = vsel %vm280_vm1, %v990_v11, 0 }
 0x127   : > { %1431 = vmatpush3.bf16.msra.mxu1 %v881_v2  ;;  %1432 = vmatprep.mubr.msk.bf16.mxu1 %vm1747_vm0, %v1746_v4 }
 0x128   : > { %1442 = vmatprep.subr.bf16.mxu1 %v1746_v4  ;;  %v1043_v9 = vpop.permute.xlu1 %1042  ;;  %v1041_v10 = vpop.permute.xlu0 %1040 }
 0x129   : > { %v1044_v22 = vsel %vm376_vm4, %v1041_v10, %v1043_v9 }
 0x12a   : > { %1415 = vmatmul.mubr.msk.bf16.vlgmr.msra.gmra.mrb[16].mxu0 %vm276_vm2, %v705_v7  ;;  %v1049_v23 = vsel %vm280_vm1, %v1044_v22, 0 }
 0x12b   : > { %1425 = vmatpush3.bf16.msra.mxu0 %v827_v8  ;;  %1426 = vmatprep.mubr.msk.bf16.mxu0 %vm1747_vm0, %v1746_v4 }
 0x12c   : > { %1436 = vmatprep.subr.bf16.mxu0 %v1746_v4  ;;  %v1097_v14 = vpop.permute.xlu1 %1096  ;;  %v1095_v15 = vpop.permute.xlu0 %1094 }
 0x12d   : > { %v1098_v19 = vsel %vm431_vm5, %v1095_v15, %v1097_v14 }
 0x12e   : > { %1433 = vmatmul.mubr.msk.bf16.vlgmr.msra.gmra.mrb[20].mxu1 %vm276_vm2, %v871_v12  ;;  %v1103_v21 = vsel %vm280_vm1, %v1098_v19, 0 }
 0x12f   : > { %1443 = vmatpush3.bf16.msra.mxu1 %v995_v13  ;;  %1444 = vmatprep.mubr.msk.bf16.mxu1 %vm1747_vm0, %v1746_v4 }
 0x130   : > { %1454 = vmatprep.subr.bf16.mxu1 %v1746_v4 }
 0x132   : > { %1427 = vmatmul.mubr.msk.bf16.vlgmr.msra.gmra.mrb[20].mxu0 %vm276_vm2, %v817_v16 }
 0x133   : > { %1437 = vmatpush3.bf16.msra.mxu0 %v932_v17  ;;  %1438 = vmatprep.mubr.msk.bf16.mxu0 %vm1747_vm0, %v1746_v4 }
 0x134   : > { %1448 = vmatprep.subr.bf16.mxu0 %v1746_v4 }
 0x136   : > { %1445 = vmatmul.mubr.msk.bf16.vlgmr.msra.gmra.mrb[24].mxu1 %vm276_vm2, %v976_v20 }
 0x137   : > { %1455 = vmatpush3.bf16.msra.mxu1 %v1103_v21  ;;  %1456 = vmatprep.mubr.msk.bf16.mxu1 %vm1747_vm0, %v1746_v4 }
 0x13a   : > { %1439 = vmatmul.mubr.msk.bf16.vlgmr.msra.gmra.mrb[24].mxu0 %vm276_vm2, %v927_v18 }
 0x13b   : > { %1449 = vmatpush3.bf16.msra.mxu0 %v1049_v23  ;;  %1450 = vmatprep.mubr.msk.bf16.mxu0 %vm1747_vm0, %v1746_v4 }
 0x13e   : > { %1457 = vmatmul.mubr.msk.bf16.vlgmr.msra.gmra.mrb[28].mxu1 %vm276_vm2, %v1093_v24 }
 0x142   : > { %1451 = vmatmul.mubr.msk.bf16.vlgmr.msra.gmra.mrb[28].mxu0 %vm276_vm2, %v1039_v25 }
 0x15e   : > { %v364_v26 = vpop.f32.mrb[0].mxu1 }
 0x15f   : > { %v1374_v27 = vpop.f32.mrb[1].mxu1 }
 0x160   : > { %v367_v28 = vpop.f32.mrb[2].mxu1 }
 0x161   : > { %v1375_v29 = vpop.f32.mrb[3].mxu1 }
 0x1dd   : > { %v318_v30 = vpop.f32.mrb[0].mxu0 }
 0x1de   : > { %v365_v31 = vadd.f32 %v364_v26, %v318_v30  ;;  %v1368_v32 = vpop.f32.mrb[1].mxu0 }
 0x1df   : > { %v321_v33 = vpop.f32.mrb[2].mxu0 }
 0x1e0   : > { %v1369_v34 = vpop.f32.mrb[3].mxu0 }
 0x1e1   : > { %v473_v35 = vpop.f32.mrb[4].mxu1 }
 0x1e2   : > { %v1386_v36 = vpop.f32.mrb[5].mxu1 }
 0x1e3   : > { %v476_v37 = vpop.f32.mrb[6].mxu1 }
 0x1e4   : > { %v1387_v38 = vpop.f32.mrb[7].mxu1 }
 0x1e5   : > { %v418_v4 = vpop.f32.mrb[4].mxu0 }
 0x1e6   : > { %v424_v39 = vadd.f32 %v418_v4, %v365_v31  ;;  %v1380_v40 = vpop.f32.mrb[5].mxu0  ;;  %v1150_v4 = vpop.permute.xlu0 %1149 }
 0x1e7   : > { %v421_v41 = vpop.f32.mrb[6].mxu0 }
 0x1e8   : > { %v479_v42 = vadd.f32 %v473_v35, %v424_v39  ;;  %v1381_v43 = vpop.f32.mrb[7].mxu0  ;;  %v1326_v41 = vld [vmem:[#allocation8] ss:$0 sm:$0xff] }
 0x1e9   : > { %v587_v44 = vpop.f32.mrb[8].mxu1 }
 0x1ea   : > { %v1398_v45 = vpop.f32.mrb[9].mxu1 }
 0x1eb   : > { %v590_v46 = vpop.f32.mrb[10].mxu1 }
 0x1ec   : > { %v1399_v47 = vpop.f32.mrb[11].mxu1 }
 0x1ed   : > { %v524_v48 = vpop.f32.mrb[8].mxu0 }
 0x1ee   : > { %v530_v49 = vadd.f32 %v524_v48, %v479_v42  ;;  %v1392_v50 = vpop.f32.mrb[9].mxu0 }
 0x1ef   : > { %v527_v51 = vpop.f32.mrb[10].mxu0 }
 0x1f0   : > { %v593_v52 = vadd.f32 %v587_v44, %v530_v49  ;;  %v1393_v53 = vpop.f32.mrb[11].mxu0 }
 0x1f1   : > { %v695_v54 = vpop.f32.mrb[12].mxu1 }
 0x1f2   : > { %v1410_v55 = vpop.f32.mrb[13].mxu1 }
 0x1f3   : > { %v698_v56 = vpop.f32.mrb[14].mxu1 }
 0x1f4   : > { %v1411_v57 = vpop.f32.mrb[15].mxu1 }
 0x1f5   : > { %v641_v58 = vpop.f32.mrb[12].mxu0 }
 0x1f6   : > { %v647_v59 = vadd.f32 %v641_v58, %v593_v52  ;;  %v1404_v60 = vpop.f32.mrb[13].mxu0 }
 0x1f7   : > { %v644_v61 = vpop.f32.mrb[14].mxu0 }
 0x1f8   : > { %v701_v62 = vadd.f32 %v695_v54, %v647_v59  ;;  %v1405_v63 = vpop.f32.mrb[15].mxu0 }
 0x1f9   : > { %v809_v0 = vpop.f32.mrb[16].mxu1 }
 0x1fa   : > { %v1422_v1 = vpop.f32.mrb[17].mxu1 }
 0x1fb   : > { %v812_v2 = vpop.f32.mrb[18].mxu1 }
 0x1fc   : > { %v1423_v3 = vpop.f32.mrb[19].mxu1 }
 0x1fd   : > { %v746_v5 = vpop.f32.mrb[16].mxu0 }
 0x1fe   : > { %v752_v6 = vadd.f32 %v746_v5, %v701_v62  ;;  %v1416_v7 = vpop.f32.mrb[17].mxu0 }
 0x1ff   : > { %v749_v8 = vpop.f32.mrb[18].mxu0 }
 0x200   : > { %v815_v9 = vadd.f32 %v809_v0, %v752_v6  ;;  %v1417_v10 = vpop.f32.mrb[19].mxu0 }
 0x201   : > { %v917_v11 = vpop.f32.mrb[20].mxu1 }
 0x202   : > { %v1434_v12 = vpop.f32.mrb[21].mxu1 }
 0x203   : > { %v920_v13 = vpop.f32.mrb[22].mxu1 }
 0x204   : > { %v1435_v14 = vpop.f32.mrb[23].mxu1 }
 0x205   : > { %v863_v15 = vpop.f32.mrb[20].mxu0 }
 0x206   : > { %v869_v16 = vadd.f32 %v863_v15, %v815_v9  ;;  %v1428_v17 = vpop.f32.mrb[21].mxu0 }
 0x207   : > { %v866_v19 = vpop.f32.mrb[22].mxu0 }
 0x208   : > { %v923_v20 = vadd.f32 %v917_v11, %v869_v16  ;;  %v1429_v21 = vpop.f32.mrb[23].mxu0 }
 0x209   : > { %v1031_v22 = vpop.f32.mrb[24].mxu1 }
 0x20a   : > { %v1446_v18 = vpop.f32.mrb[25].mxu1 }
 0x20b   : > { %v1034_v23 = vpop.f32.mrb[26].mxu1 }
 0x20c   : > { %v1447_v24 = vpop.f32.mrb[27].mxu1 }
 0x20d   : > { %v968_v25 = vpop.f32.mrb[24].mxu0 }
 0x20e   : > { %v974_v26 = vadd.f32 %v968_v25, %v923_v20  ;;  %v1440_v27 = vpop.f32.mrb[25].mxu0 }
 0x20f   : > { %v971_v28 = vpop.f32.mrb[26].mxu0 }
 0x210   : > { %v1037_v29 = vadd.f32 %v1031_v22, %v974_v26  ;;  %v1441_v30 = vpop.f32.mrb[27].mxu0 }
 0x211   : > { %v1139_v31 = vpop.f32.mrb[28].mxu1 }
 0x212   : > { %v1458_v32 = vpop.f32.mrb[29].mxu1 }
 0x213   : > { %v1142_v33 = vpop.f32.mrb[30].mxu1 }
 0x214   : > { %v1459_v34 = vpop.f32.mrb[31].mxu1 }
 0x215   : > { %v1085_v35 = vpop.f32.mrb[28].mxu0 }
 0x216   : > { %v1091_v36 = vadd.f32 %v1085_v35, %v1037_v29  ;;  %v1452_v37 = vpop.f32.mrb[29].mxu0 }
 0x217   : > { %v1088_v38 = vpop.f32.mrb[30].mxu0 }
 0x218   : > { %v1145_v39 = vadd.f32 %v1139_v31, %v1091_v36  ;;  %v1453_v40 = vpop.f32.mrb[31].mxu0 }
 0x21a   : > { %v1152_v42 = vadd.f32 %v1150_v4, %v1145_v39 }
 0x21c   : > { %v1160_v43 = vmul.f32 %v1326_v41, %v1152_v42 }
 0x21e   : > { %1161 = vadd.xlane.f32.xlu1 %v1160_v43  ;;  %v1164_v44 = vmul.f32 %v1160_v43, %v1160_v43 }
 0x220   : > { %1165 = vadd.xlane.f32.xlu0 %v1164_v44 }
 0x2ab   : > { %v1162_v45 = vpop.xlane.xlu1 %1161 }
 0x2ac   : > { %v1163_v46 = vmul.f32 0.015625, %v1162_v45 }
 0x2ad   : > { %v1166_v47 = vpop.xlane.xlu0 %1165 }
 0x2ae   : > { %v1168_v48 = vmul.f32 %v1163_v46, %v1163_v46  ;;  %v1167_v49 = vmul.f32 0.015625, %v1166_v47  ;;  %v1171_v53 = vsub.f32 %v1152_v42, %v1163_v46 }
 0x2b0   : > { %v1169_v50 = vsub.f32 %v1167_v49, %v1168_v48 }
 0x2b2   : > { %v1170_v51 = vmax.f32 %v1169_v50, 0.0 }
 0x2b4   : > { %v1172_v52 = vadd.f32 1e-05, %v1170_v51 }
 0x2b6   : > { %1547 = vrsqrt.f32 %v1172_v52 }
 0x2c0   : > { %v1548_v54 = vpop.eup %1547 }
 0x2c1   : > { %v1174_v55 = vmul.f32 %v1548_v54, %v1171_v53 }
 0x2c3   : > { %vm1175_vm6 = vcmp.gt.f32.partialorder %v1174_v55, 0.0  ;;  %v1176_v56 = vmul.f32 0.2, %v1174_v55 }
 0x2c5   : > { %v1177_v57 = vsel %vm1175_vm6, %v1174_v55, %v1176_v56 }
 0x2c6   : > { %1178 = vst [vmem:[%s255_s9] sm:$0xff] %v1177_v57 }
 0x2c7   : > { %1676 = shalt.err (!%p1673_p4)
}
 0x2c8   : > { %s1677_s25 = scalar_lea.hbm %s2124_s27, 128  ;;  %s1681_s21 = scalar_lea.hbm %s2172_s4, 256 }
 0x2c9   : > { %p1678_p9 = scmp.ne.s32.totalorder %s2124_s27, %s1677_s25  ;;  %p1682_p8 = scmp.lt.u32.totalorder %s2124_s27, %s2172_s4 }
 0x2ca   : > { %p1683_p13 = scmp.lt.u32.totalorder %s1681_s21, %s1677_s25  ;;  %p1685_p10 = scmp.lt.u32.totalorder %s1677_s25, %s2124_s27 }
 0x2cb   : > { %p1679_p0 = pnand %p1678_p9, %p1926_p5 }
 0x2cc   : > { %p1684_p6 = por %p1683_p13, %p1682_p8 }
 0x2cd   : > { %p1680_p11 = pneg %p1679_p0 }
 0x2ce   : > { %p1686_p3 = por %p1685_p10, %p1684_p6 }
 0x2d0   : > { %p1687_p7 = pnand %p1686_p3, %p1680_p11 }
 0x2d2   : > { %1690 = shalt.err (!%p1687_p7)
}
 0x2d3   : > { %1474 = dma.vmem_to_hbm [thread:$0]  (%p1926_p5), %s2126_s28, 128, %s2124_s27, %s1180_s6  }
 0x2d4 PF: > { %s1205_s20 = sand.u32 1, %s1725_s15   ;;  %p2190_p12 = scmp.ne.s32.totalorder %s2177_s22, 0 }
 0x2d5   : > { %p2191_p1 = scmp.ge.s32.totalorder %s1737_s18, 2  ;;  %s1206_s7 = scalar_lea.sflag [#allocation4], %s1205_s20 }
 0x2d7   : > { %p1491_p2 = pnand %p2191_p1, %p2190_p12 }
 0x2d9   : > { %1720 = dma.done.wait (!%p1491_p2), %s1206_s7, 128  }
 0x2da   : > { %1722 = vsyncadd (!%p1491_p2), %s1206_s7, 4294967168  ;;  %p19_p4 = scmp.ge.s32.totalorder %s1912_s10, 4   ;;  %s2192_s15 = smov %s1729_s16 }
 0x2db   : > { %s2193_s16 = smov %s1733_s17  ;;  %s2194_s17 = smov %s1922_s13 }
 0x2dc   : > { %s2195_s18 = smov %s1912_s10  ;;  %21 = sbr.rel (!%p19_p4) target bundleno = 7 (0x7), region = 111 }
 0x2e3   :  { %1211 = vsyncpa [#allocation3], 1 }
 0x2e4   :  { %1213 = vsyncpa [#allocation3 + $0x1], 1 }
 0x2e5   :  { %1214 = vsyncpa [#allocation6], 1 }
 0x2e6   :  { %1215 = vsyncpa [#allocation9], 1 }
 0x2e7   :  { %1216 = vsyncpa [#allocation4], 1 }
 0x2e8   :  { %1218 = vsyncpa [#allocation4 + $0x1], 1 }

</bundles_post_ra>
